<compile_context>
chip_gen: v5e
topology: v5e:2x2
jax: 0.10.0
libtpu: 0.0.40
codegen_flags: <defaults>
</compile_context>

<pallas_src>
import functools

import jax
import jax.numpy as jnp
from jax.experimental import pallas as pl
from jax.experimental.pallas import tpu as pltpu


def lstm_head_kernel(x_ref, wih_ref, whh_ref, b_ref, wout_ref, bout_ref,
                     out_ref, *, seq_len, batch_pad, hidden):
    """Single grid step: full LSTM recurrence + classifier + log-softmax.

    x_ref:    (seq_len * batch_pad, input_dim)   time-major flattened embeddings
    wih_ref:  (input_dim, 4h)
    whh_ref:  (4h, 4h)       rows >= hidden are zero (padded)
    b_ref:    (1, 4h)        b_ih + b_hh
    wout_ref: (4h, 128)      rows >= hidden and cols >= n_cls are zero (padded)
    bout_ref: (1, 128)       cols >= n_cls are a large negative constant
    out_ref:  (batch_pad, 128) lane-dense log-softmax output
    """
    four_h = 4 * hidden

    # Hoist all loop-invariant loads.
    wih = wih_ref[...]
    whh = whh_ref[...]
    wout = wout_ref[...]
    bias = b_ref[...]
    bout = bout_ref[...]

    # Time-parallel input projection: one MXU pass for all timesteps.
    gx_all = (jnp.dot(x_ref[...], wih, preferred_element_type=jnp.float32)
              + bias)                                  # (seq*bp, 4h)

    # Static lane masks (built once).
    lane = jax.lax.broadcasted_iota(jnp.int32, (batch_pad, four_h), 1)
    is_g_lane = (lane >= 2 * hidden) & (lane < 3 * hidden)   # tanh gate lanes
    keep_h_lane = lane < hidden                              # real h/c lanes

    h = jnp.zeros((batch_pad, four_h), jnp.float32)
    c = jnp.zeros((batch_pad, four_h), jnp.float32)

    # Fully-unrolled recurrence (seq_len is small & static) — no per-step grid
    # overhead, and the LLO scheduler sees across timesteps.
    for t in range(seq_len):
        gates = (gx_all[t * batch_pad:(t + 1) * batch_pad, :]
                 + jnp.dot(h, whh, preferred_element_type=jnp.float32))

        # Nonlinearities on the full (bp, 4h) slab (EUP), one lane-mask blend:
        # act = [ i | f | g | o ] with sigmoid on i/f/o, tanh on g.
        act = jnp.where(is_g_lane, jnp.tanh(gates), jax.nn.sigmoid(gates))

        # Align f/g/o onto lanes [0, hidden) via cheap XLU rotations
        # (no sub-128-lane slicing).
        f_al = pltpu.roll(act, shift=3 * hidden, axis=1)
        g_al = pltpu.roll(act, shift=2 * hidden, axis=1)
        o_al = pltpu.roll(act, shift=1 * hidden, axis=1)

        # act lanes [0,h) hold i; c/h are kept zero outside lanes [0,h).
        c = jnp.where(keep_h_lane, f_al * c + act * g_al, 0.0)
        h = jnp.where(keep_h_lane, o_al * jnp.tanh(c), 0.0)

    # Classifier on the final hidden state, lane-dense (128-wide) logits.
    logits = jnp.dot(h, wout, preferred_element_type=jnp.float32) + bout
    m = jnp.max(logits, axis=1, keepdims=True)
    z = logits - m
    lse = jnp.log(jnp.sum(jnp.exp(z), axis=1, keepdims=True))
    out_ref[...] = z - lse                              # log-softmax over dim=1


def rnn_forward(inputs, params):
    """inputs: int32 (seq_len, batch) token ids. Returns (batch, 5) log-probs."""
    emb = params["embedding"]          # (vocab, input_dim), frozen
    w_ih_t = params["w_ih_t"]          # (input_dim, 4h)
    w_hh_t = params["w_hh_t"]          # (h, 4h)
    b = params["b"]                    # (1, 4h)  == b_ih + b_hh
    w_out_t = params["w_out_t"]        # (h, 5)
    b_out = params["b_out"]            # (1, 5)

    seq_len, batch = inputs.shape
    input_dim = emb.shape[1]
    hidden = w_hh_t.shape[0]
    n_cls = w_out_t.shape[1]
    four_h = 4 * hidden

    batch_pad = ((batch + 7) // 8) * 8          # sublane-pad batch to 8
    out_lanes = 128                             # lane-dense classifier width

    # Embedding gather (glue) — nn.Embedding.from_pretrained(..., freeze=True)
    embedded = emb[inputs]                       # (seq, batch, input_dim)
    emb_pad = jnp.zeros((seq_len, batch_pad, input_dim), jnp.float32)
    emb_pad = emb_pad.at[:, :batch, :].set(embedded)
    x_all = emb_pad.reshape(seq_len * batch_pad, input_dim)

    # Pad weights so all in-kernel tensors are lane-dense and rolls stay exact.
    w_hh_pad = jnp.zeros((four_h, four_h), jnp.float32).at[:hidden, :].set(w_hh_t)
    w_out_pad = jnp.zeros((four_h, out_lanes), jnp.float32)
    w_out_pad = w_out_pad.at[:hidden, :n_cls].set(w_out_t)
    b_out_pad = jnp.full((1, out_lanes), -1e30, jnp.float32)  # padded classes ~ exp()->0
    b_out_pad = b_out_pad.at[:, :n_cls].set(b_out)

    kernel = functools.partial(lstm_head_kernel, seq_len=seq_len,
                               batch_pad=batch_pad, hidden=hidden)

    out_pad = pl.pallas_call(
        kernel,
        out_shape=jax.ShapeDtypeStruct((batch_pad, out_lanes), jnp.float32),
        grid_spec=pltpu.PrefetchScalarGridSpec(
            num_scalar_prefetch=0,
            grid=(1,),                                    # single step: no per-timestep grid overhead
            in_specs=[
                pl.BlockSpec((seq_len * batch_pad, input_dim), lambda i: (0, 0)),
                pl.BlockSpec((input_dim, four_h), lambda i: (0, 0)),
                pl.BlockSpec((four_h, four_h), lambda i: (0, 0)),
                pl.BlockSpec((1, four_h), lambda i: (0, 0)),
                pl.BlockSpec((four_h, out_lanes), lambda i: (0, 0)),
                pl.BlockSpec((1, out_lanes), lambda i: (0, 0)),
            ],
            out_specs=pl.BlockSpec((batch_pad, out_lanes), lambda i: (0, 0)),
        ),
        compiler_params=pltpu.CompilerParams(
            dimension_semantics=("arbitrary",)),
    )(x_all, w_ih_t, w_hh_pad, b, w_out_pad, b_out_pad)

    return out_pad[:batch, :n_cls]


def reference_forward(inputs, params):
    """Pure-JAX reference matching the PyTorch module semantics."""
    emb = params["embedding"]
    embedded = emb[inputs]                         # (seq, batch, in)
    hidden = params["w_hh_t"].shape[0]
    batch = inputs.shape[1]
    h = jnp.zeros((batch, hidden), jnp.float32)
    c = jnp.zeros((batch, hidden), jnp.float32)

    def step(carry, x_t):
        h, c = carry
        gates = x_t @ params["w_ih_t"] + h @ params["w_hh_t"] + params["b"]
        i = jax.nn.sigmoid(gates[:, 0 * hidden:1 * hidden])
        f = jax.nn.sigmoid(gates[:, 1 * hidden:2 * hidden])
        g = jnp.tanh(gates[:, 2 * hidden:3 * hidden])
        o = jax.nn.sigmoid(gates[:, 3 * hidden:4 * hidden])
        c = f * c + i * g
        h = o * jnp.tanh(c)
        return (h, c), None

    (h, _), _ = jax.lax.scan(step, (h, c), embedded)
    logits = h @ params["w_out_t"] + params["b_out"]
    return jax.nn.log_softmax(logits, axis=1)


if __name__ == "__main__":
    # Small shapes consistent with the module's forward.
    vocab_size = 20
    input_dim = 16
    hidden = 32
    seq_len = 8
    batch = 2
    n_cls = 5

    key = jax.random.PRNGKey(0)
    k_emb, k_ih, k_hh, k_bih, k_bhh, k_w, k_b, k_in = jax.random.split(key, 8)

    scale = 1.0 / jnp.sqrt(hidden)
    params = {
        "embedding": jax.random.normal(k_emb, (vocab_size, input_dim),
                                       jnp.float32),
        # PyTorch stores W_ih:(4h,in), W_hh:(4h,h); we pre-transpose.
        "w_ih_t": (jax.random.uniform(k_ih, (4 * hidden, input_dim),
                                      jnp.float32, -1, 1) * scale).T,
        "w_hh_t": (jax.random.uniform(k_hh, (4 * hidden, hidden),
                                      jnp.float32, -1, 1) * scale).T,
        "b": ((jax.random.uniform(k_bih, (4 * hidden,), jnp.float32, -1, 1)
               + jax.random.uniform(k_bhh, (4 * hidden,), jnp.float32, -1, 1))
              * scale)[None, :],
        "w_out_t": (jax.random.uniform(k_w, (n_cls, hidden),
                                       jnp.float32, -1, 1) * scale).T,
        "b_out": (jax.random.uniform(k_b, (n_cls,), jnp.float32, -1, 1)
                  * scale)[None, :],
    }

    inputs = jax.random.randint(k_in, (seq_len, batch), 0, vocab_size,
                                dtype=jnp.int32)

    out = jax.block_until_ready(rnn_forward(inputs, params))
    ref = jax.block_until_ready(reference_forward(inputs, params))

    assert out.shape == (batch, n_cls)
    assert jnp.allclose(out, ref, atol=1e-5, rtol=1e-5), (out, ref)
    print("KERNEL_OK")
</pallas_src>

<mosaic_0001>
module attributes {stable_mosaic.version = 11 : i64} {
  func.func @lstm_head_kernel(%arg0: i32, %arg1: memref<64x16xf32, #tpu.memory_space<vmem>>, %arg2: memref<16x128xf32, #tpu.memory_space<vmem>>, %arg3: memref<128x128xf32, #tpu.memory_space<vmem>>, %arg4: memref<1x128xf32, #tpu.memory_space<vmem>>, %arg5: memref<128x128xf32, #tpu.memory_space<vmem>>, %arg6: memref<1x128xf32, #tpu.memory_space<vmem>>, %arg7: memref<8x128xf32, #tpu.memory_space<vmem>>) attributes {dimension_semantics = [#tpu.dimension_semantics<arbitrary>], iteration_bounds = array<i64: 1>, scalar_prefetch = 0 : i64, scratch_operands = 0 : i64, tpu.core_type = #tpu.core_type<tc>, window_params = [{pipeline_mode = #tpu.pipeline_mode<synchronous>, transform_indices = @transform_0, window_bounds = array<i64: 64, 16>}, {pipeline_mode = #tpu.pipeline_mode<synchronous>, transform_indices = @transform_1, window_bounds = array<i64: 16, 128>}, {pipeline_mode = #tpu.pipeline_mode<synchronous>, transform_indices = @transform_2, window_bounds = array<i64: 128, 128>}, {pipeline_mode = #tpu.pipeline_mode<synchronous>, transform_indices = @transform_3, window_bounds = array<i64: 1, 128>}, {pipeline_mode = #tpu.pipeline_mode<synchronous>, transform_indices = @transform_4, window_bounds = array<i64: 128, 128>}, {pipeline_mode = #tpu.pipeline_mode<synchronous>, transform_indices = @transform_5, window_bounds = array<i64: 1, 128>}, {pipeline_mode = #tpu.pipeline_mode<synchronous>, transform_indices = @transform_6, window_bounds = array<i64: 8, 128>}]} {
    %c0 = arith.constant 0 : index
    %c0_0 = arith.constant 0 : index
    %0 = vector.load %arg2[%c0, %c0_0] : memref<16x128xf32, #tpu.memory_space<vmem>>, vector<16x128xf32>
    %c0_1 = arith.constant 0 : index
    %c0_2 = arith.constant 0 : index
    %1 = vector.load %arg3[%c0_1, %c0_2] : memref<128x128xf32, #tpu.memory_space<vmem>>, vector<128x128xf32>
    %c0_3 = arith.constant 0 : index
    %c0_4 = arith.constant 0 : index
    %2 = vector.load %arg5[%c0_3, %c0_4] : memref<128x128xf32, #tpu.memory_space<vmem>>, vector<128x128xf32>
    %c0_5 = arith.constant 0 : index
    %c0_6 = arith.constant 0 : index
    %3 = vector.load %arg4[%c0_5, %c0_6] : memref<1x128xf32, #tpu.memory_space<vmem>>, vector<1x128xf32>
    %c0_7 = arith.constant 0 : index
    %c0_8 = arith.constant 0 : index
    %4 = vector.load %arg6[%c0_7, %c0_8] : memref<1x128xf32, #tpu.memory_space<vmem>>, vector<1x128xf32>
    %c0_9 = arith.constant 0 : index
    %c0_10 = arith.constant 0 : index
    %5 = vector.load %arg1[%c0_9, %c0_10] : memref<64x16xf32, #tpu.memory_space<vmem>>, vector<64x16xf32>
    %cst = arith.constant dense<0.000000e+00> : vector<64x128xf32>
    %6 = tpu.matmul %5, %0, %cst {dimension_numbers = #tpu.dot_dimension_numbers<[1], [0], [0], [1], [0, 0, 1, 1], [], []>} : vector<64x16xf32>, vector<16x128xf32>, vector<64x128xf32> -> vector<64x128xf32>
    %7 = vector.broadcast %3 : vector<1x128xf32> to vector<64x128xf32>
    %8 = arith.addf %6, %7 : vector<64x128xf32>
    %9 = tpu.iota {dimensions = array<i32: 1>} : vector<8x128xi32>
    %c64_i32 = arith.constant 64 : i32
    %10 = vector.broadcast %c64_i32 : i32 to vector<8x128xi32>
    %11 = arith.cmpi sge, %9, %10 : vector<8x128xi32>
    %c96_i32 = arith.constant 96 : i32
    %12 = vector.broadcast %c96_i32 : i32 to vector<8x128xi32>
    %13 = arith.cmpi slt, %9, %12 : vector<8x128xi32>
    %14 = arith.andi %11, %13 : vector<8x128xi1>
    %c32_i32 = arith.constant 32 : i32
    %15 = vector.broadcast %c32_i32 : i32 to vector<8x128xi32>
    %16 = arith.cmpi slt, %9, %15 : vector<8x128xi32>
    %cst_11 = arith.constant 0.000000e+00 : f32
    %17 = vector.broadcast %cst_11 : f32 to vector<8x128xf32>
    %cst_12 = arith.constant 0.000000e+00 : f32
    %18 = vector.broadcast %cst_12 : f32 to vector<8x128xf32>
    %19 = vector.extract_strided_slice %8 {offsets = [0, 0], sizes = [8, 128], strides = [1, 1]} : vector<64x128xf32> to vector<8x128xf32>
    %cst_13 = arith.constant dense<0.000000e+00> : vector<8x128xf32>
    %20 = tpu.matmul %17, %1, %cst_13 {dimension_numbers = #tpu.dot_dimension_numbers<[1], [0], [0], [1], [0, 0, 1, 1], [], []>} : vector<8x128xf32>, vector<128x128xf32>, vector<8x128xf32> -> vector<8x128xf32>
    %21 = arith.addf %19, %20 : vector<8x128xf32>
    %22 = math.tanh %21 : vector<8x128xf32>
    %23 = arith.negf %21 : vector<8x128xf32>
    %24 = math.exp %23 : vector<8x128xf32>
    %cst_14 = arith.constant 1.000000e+00 : f32
    %25 = vector.broadcast %cst_14 : f32 to vector<8x128xf32>
    %26 = arith.addf %25, %24 : vector<8x128xf32>
    %27 = arith.divf %25, %26 : vector<8x128xf32>
    %28 = arith.select %14, %22, %27 : vector<8x128xi1>, vector<8x128xf32>
    %c96_i32_15 = arith.constant 96 : i32
    %29 = tpu.dynamic_rotate %28 by %c96_i32_15 dim 1 : vector<8x128xf32>, i32 -> vector<8x128xf32>
    %c64_i32_16 = arith.constant 64 : i32
    %30 = tpu.dynamic_rotate %28 by %c64_i32_16 dim 1 : vector<8x128xf32>, i32 -> vector<8x128xf32>
    %c32_i32_17 = arith.constant 32 : i32
    %31 = tpu.dynamic_rotate %28 by %c32_i32_17 dim 1 : vector<8x128xf32>, i32 -> vector<8x128xf32>
    %32 = arith.mulf %29, %18 : vector<8x128xf32>
    %33 = arith.mulf %28, %30 : vector<8x128xf32>
    %34 = arith.addf %32, %33 : vector<8x128xf32>
    %cst_18 = arith.constant 0.000000e+00 : f32
    %35 = vector.broadcast %cst_18 : f32 to vector<8x128xf32>
    %36 = arith.select %16, %34, %35 : vector<8x128xi1>, vector<8x128xf32>
    %37 = math.tanh %36 : vector<8x128xf32>
    %38 = arith.mulf %31, %37 : vector<8x128xf32>
    %cst_19 = arith.constant 0.000000e+00 : f32
    %39 = vector.broadcast %cst_19 : f32 to vector<8x128xf32>
    %40 = arith.select %16, %38, %39 : vector<8x128xi1>, vector<8x128xf32>
    %41 = vector.extract_strided_slice %8 {offsets = [8, 0], sizes = [8, 128], strides = [1, 1]} : vector<64x128xf32> to vector<8x128xf32>
    %cst_20 = arith.constant dense<0.000000e+00> : vector<8x128xf32>
    %42 = tpu.matmul %40, %1, %cst_20 {dimension_numbers = #tpu.dot_dimension_numbers<[1], [0], [0], [1], [0, 0, 1, 1], [], []>} : vector<8x128xf32>, vector<128x128xf32>, vector<8x128xf32> -> vector<8x128xf32>
    %43 = arith.addf %41, %42 : vector<8x128xf32>
    %44 = math.tanh %43 : vector<8x128xf32>
    %45 = arith.negf %43 : vector<8x128xf32>
    %46 = math.exp %45 : vector<8x128xf32>
    %cst_21 = arith.constant 1.000000e+00 : f32
    %47 = vector.broadcast %cst_21 : f32 to vector<8x128xf32>
    %48 = arith.addf %47, %46 : vector<8x128xf32>
    %49 = arith.divf %47, %48 : vector<8x128xf32>
    %50 = arith.select %14, %44, %49 : vector<8x128xi1>, vector<8x128xf32>
    %c96_i32_22 = arith.constant 96 : i32
    %51 = tpu.dynamic_rotate %50 by %c96_i32_22 dim 1 : vector<8x128xf32>, i32 -> vector<8x128xf32>
    %c64_i32_23 = arith.constant 64 : i32
    %52 = tpu.dynamic_rotate %50 by %c64_i32_23 dim 1 : vector<8x128xf32>, i32 -> vector<8x128xf32>
    %c32_i32_24 = arith.constant 32 : i32
    %53 = tpu.dynamic_rotate %50 by %c32_i32_24 dim 1 : vector<8x128xf32>, i32 -> vector<8x128xf32>
    %54 = arith.mulf %51, %36 : vector<8x128xf32>
    %55 = arith.mulf %50, %52 : vector<8x128xf32>
    %56 = arith.addf %54, %55 : vector<8x128xf32>
    %cst_25 = arith.constant 0.000000e+00 : f32
    %57 = vector.broadcast %cst_25 : f32 to vector<8x128xf32>
    %58 = arith.select %16, %56, %57 : vector<8x128xi1>, vector<8x128xf32>
    %59 = math.tanh %58 : vector<8x128xf32>
    %60 = arith.mulf %53, %59 : vector<8x128xf32>
    %cst_26 = arith.constant 0.000000e+00 : f32
    %61 = vector.broadcast %cst_26 : f32 to vector<8x128xf32>
    %62 = arith.select %16, %60, %61 : vector<8x128xi1>, vector<8x128xf32>
    %63 = vector.extract_strided_slice %8 {offsets = [16, 0], sizes = [8, 128], strides = [1, 1]} : vector<64x128xf32> to vector<8x128xf32>
    %cst_27 = arith.constant dense<0.000000e+00> : vector<8x128xf32>
    %64 = tpu.matmul %62, %1, %cst_27 {dimension_numbers = #tpu.dot_dimension_numbers<[1], [0], [0], [1], [0, 0, 1, 1], [], []>} : vector<8x128xf32>, vector<128x128xf32>, vector<8x128xf32> -> vector<8x128xf32>
    %65 = arith.addf %63, %64 : vector<8x128xf32>
    %66 = math.tanh %65 : vector<8x128xf32>
    %67 = arith.negf %65 : vector<8x128xf32>
    %68 = math.exp %67 : vector<8x128xf32>
    %cst_28 = arith.constant 1.000000e+00 : f32
    %69 = vector.broadcast %cst_28 : f32 to vector<8x128xf32>
    %70 = arith.addf %69, %68 : vector<8x128xf32>
    %71 = arith.divf %69, %70 : vector<8x128xf32>
    %72 = arith.select %14, %66, %71 : vector<8x128xi1>, vector<8x128xf32>
    %c96_i32_29 = arith.constant 96 : i32
    %73 = tpu.dynamic_rotate %72 by %c96_i32_29 dim 1 : vector<8x128xf32>, i32 -> vector<8x128xf32>
    %c64_i32_30 = arith.constant 64 : i32
    %74 = tpu.dynamic_rotate %72 by %c64_i32_30 dim 1 : vector<8x128xf32>, i32 -> vector<8x128xf32>
    %c32_i32_31 = arith.constant 32 : i32
    %75 = tpu.dynamic_rotate %72 by %c32_i32_31 dim 1 : vector<8x128xf32>, i32 -> vector<8x128xf32>
    %76 = arith.mulf %73, %58 : vector<8x128xf32>
    %77 = arith.mulf %72, %74 : vector<8x128xf32>
    %78 = arith.addf %76, %77 : vector<8x128xf32>
    %cst_32 = arith.constant 0.000000e+00 : f32
    %79 = vector.broadcast %cst_32 : f32 to vector<8x128xf32>
    %80 = arith.select %16, %78, %79 : vector<8x128xi1>, vector<8x128xf32>
    %81 = math.tanh %80 : vector<8x128xf32>
    %82 = arith.mulf %75, %81 : vector<8x128xf32>
    %cst_33 = arith.constant 0.000000e+00 : f32
    %83 = vector.broadcast %cst_33 : f32 to vector<8x128xf32>
    %84 = arith.select %16, %82, %83 : vector<8x128xi1>, vector<8x128xf32>
    %85 = vector.extract_strided_slice %8 {offsets = [24, 0], sizes = [8, 128], strides = [1, 1]} : vector<64x128xf32> to vector<8x128xf32>
    %cst_34 = arith.constant dense<0.000000e+00> : vector<8x128xf32>
    %86 = tpu.matmul %84, %1, %cst_34 {dimension_numbers = #tpu.dot_dimension_numbers<[1], [0], [0], [1], [0, 0, 1, 1], [], []>} : vector<8x128xf32>, vector<128x128xf32>, vector<8x128xf32> -> vector<8x128xf32>
    %87 = arith.addf %85, %86 : vector<8x128xf32>
    %88 = math.tanh %87 : vector<8x128xf32>
    %89 = arith.negf %87 : vector<8x128xf32>
    %90 = math.exp %89 : vector<8x128xf32>
    %cst_35 = arith.constant 1.000000e+00 : f32
    %91 = vector.broadcast %cst_35 : f32 to vector<8x128xf32>
    %92 = arith.addf %91, %90 : vector<8x128xf32>
    %93 = arith.divf %91, %92 : vector<8x128xf32>
    %94 = arith.select %14, %88, %93 : vector<8x128xi1>, vector<8x128xf32>
    %c96_i32_36 = arith.constant 96 : i32
    %95 = tpu.dynamic_rotate %94 by %c96_i32_36 dim 1 : vector<8x128xf32>, i32 -> vector<8x128xf32>
    %c64_i32_37 = arith.constant 64 : i32
    %96 = tpu.dynamic_rotate %94 by %c64_i32_37 dim 1 : vector<8x128xf32>, i32 -> vector<8x128xf32>
    %c32_i32_38 = arith.constant 32 : i32
    %97 = tpu.dynamic_rotate %94 by %c32_i32_38 dim 1 : vector<8x128xf32>, i32 -> vector<8x128xf32>
    %98 = arith.mulf %95, %80 : vector<8x128xf32>
    %99 = arith.mulf %94, %96 : vector<8x128xf32>
    %100 = arith.addf %98, %99 : vector<8x128xf32>
    %cst_39 = arith.constant 0.000000e+00 : f32
    %101 = vector.broadcast %cst_39 : f32 to vector<8x128xf32>
    %102 = arith.select %16, %100, %101 : vector<8x128xi1>, vector<8x128xf32>
    %103 = math.tanh %102 : vector<8x128xf32>
    %104 = arith.mulf %97, %103 : vector<8x128xf32>
    %cst_40 = arith.constant 0.000000e+00 : f32
    %105 = vector.broadcast %cst_40 : f32 to vector<8x128xf32>
    %106 = arith.select %16, %104, %105 : vector<8x128xi1>, vector<8x128xf32>
    %107 = vector.extract_strided_slice %8 {offsets = [32, 0], sizes = [8, 128], strides = [1, 1]} : vector<64x128xf32> to vector<8x128xf32>
    %cst_41 = arith.constant dense<0.000000e+00> : vector<8x128xf32>
    %108 = tpu.matmul %106, %1, %cst_41 {dimension_numbers = #tpu.dot_dimension_numbers<[1], [0], [0], [1], [0, 0, 1, 1], [], []>} : vector<8x128xf32>, vector<128x128xf32>, vector<8x128xf32> -> vector<8x128xf32>
    %109 = arith.addf %107, %108 : vector<8x128xf32>
    %110 = math.tanh %109 : vector<8x128xf32>
    %111 = arith.negf %109 : vector<8x128xf32>
    %112 = math.exp %111 : vector<8x128xf32>
    %cst_42 = arith.constant 1.000000e+00 : f32
    %113 = vector.broadcast %cst_42 : f32 to vector<8x128xf32>
    %114 = arith.addf %113, %112 : vector<8x128xf32>
    %115 = arith.divf %113, %114 : vector<8x128xf32>
    %116 = arith.select %14, %110, %115 : vector<8x128xi1>, vector<8x128xf32>
    %c96_i32_43 = arith.constant 96 : i32
    %117 = tpu.dynamic_rotate %116 by %c96_i32_43 dim 1 : vector<8x128xf32>, i32 -> vector<8x128xf32>
    %c64_i32_44 = arith.constant 64 : i32
    %118 = tpu.dynamic_rotate %116 by %c64_i32_44 dim 1 : vector<8x128xf32>, i32 -> vector<8x128xf32>
    %c32_i32_45 = arith.constant 32 : i32
    %119 = tpu.dynamic_rotate %116 by %c32_i32_45 dim 1 : vector<8x128xf32>, i32 -> vector<8x128xf32>
    %120 = arith.mulf %117, %102 : vector<8x128xf32>
    %121 = arith.mulf %116, %118 : vector<8x128xf32>
    %122 = arith.addf %120, %121 : vector<8x128xf32>
    %cst_46 = arith.constant 0.000000e+00 : f32
    %123 = vector.broadcast %cst_46 : f32 to vector<8x128xf32>
    %124 = arith.select %16, %122, %123 : vector<8x128xi1>, vector<8x128xf32>
    %125 = math.tanh %124 : vector<8x128xf32>
    %126 = arith.mulf %119, %125 : vector<8x128xf32>
    %cst_47 = arith.constant 0.000000e+00 : f32
    %127 = vector.broadcast %cst_47 : f32 to vector<8x128xf32>
    %128 = arith.select %16, %126, %127 : vector<8x128xi1>, vector<8x128xf32>
    %129 = vector.extract_strided_slice %8 {offsets = [40, 0], sizes = [8, 128], strides = [1, 1]} : vector<64x128xf32> to vector<8x128xf32>
    %cst_48 = arith.constant dense<0.000000e+00> : vector<8x128xf32>
    %130 = tpu.matmul %128, %1, %cst_48 {dimension_numbers = #tpu.dot_dimension_numbers<[1], [0], [0], [1], [0, 0, 1, 1], [], []>} : vector<8x128xf32>, vector<128x128xf32>, vector<8x128xf32> -> vector<8x128xf32>
    %131 = arith.addf %129, %130 : vector<8x128xf32>
    %132 = math.tanh %131 : vector<8x128xf32>
    %133 = arith.negf %131 : vector<8x128xf32>
    %134 = math.exp %133 : vector<8x128xf32>
    %cst_49 = arith.constant 1.000000e+00 : f32
    %135 = vector.broadcast %cst_49 : f32 to vector<8x128xf32>
    %136 = arith.addf %135, %134 : vector<8x128xf32>
    %137 = arith.divf %135, %136 : vector<8x128xf32>
    %138 = arith.select %14, %132, %137 : vector<8x128xi1>, vector<8x128xf32>
    %c96_i32_50 = arith.constant 96 : i32
    %139 = tpu.dynamic_rotate %138 by %c96_i32_50 dim 1 : vector<8x128xf32>, i32 -> vector<8x128xf32>
    %c64_i32_51 = arith.constant 64 : i32
    %140 = tpu.dynamic_rotate %138 by %c64_i32_51 dim 1 : vector<8x128xf32>, i32 -> vector<8x128xf32>
    %c32_i32_52 = arith.constant 32 : i32
    %141 = tpu.dynamic_rotate %138 by %c32_i32_52 dim 1 : vector<8x128xf32>, i32 -> vector<8x128xf32>
    %142 = arith.mulf %139, %124 : vector<8x128xf32>
    %143 = arith.mulf %138, %140 : vector<8x128xf32>
    %144 = arith.addf %142, %143 : vector<8x128xf32>
    %cst_53 = arith.constant 0.000000e+00 : f32
    %145 = vector.broadcast %cst_53 : f32 to vector<8x128xf32>
    %146 = arith.select %16, %144, %145 : vector<8x128xi1>, vector<8x128xf32>
    %147 = math.tanh %146 : vector<8x128xf32>
    %148 = arith.mulf %141, %147 : vector<8x128xf32>
    %cst_54 = arith.constant 0.000000e+00 : f32
    %149 = vector.broadcast %cst_54 : f32 to vector<8x128xf32>
    %150 = arith.select %16, %148, %149 : vector<8x128xi1>, vector<8x128xf32>
    %151 = vector.extract_strided_slice %8 {offsets = [48, 0], sizes = [8, 128], strides = [1, 1]} : vector<64x128xf32> to vector<8x128xf32>
    %cst_55 = arith.constant dense<0.000000e+00> : vector<8x128xf32>
    %152 = tpu.matmul %150, %1, %cst_55 {dimension_numbers = #tpu.dot_dimension_numbers<[1], [0], [0], [1], [0, 0, 1, 1], [], []>} : vector<8x128xf32>, vector<128x128xf32>, vector<8x128xf32> -> vector<8x128xf32>
    %153 = arith.addf %151, %152 : vector<8x128xf32>
    %154 = math.tanh %153 : vector<8x128xf32>
    %155 = arith.negf %153 : vector<8x128xf32>
    %156 = math.exp %155 : vector<8x128xf32>
    %cst_56 = arith.constant 1.000000e+00 : f32
    %157 = vector.broadcast %cst_56 : f32 to vector<8x128xf32>
    %158 = arith.addf %157, %156 : vector<8x128xf32>
    %159 = arith.divf %157, %158 : vector<8x128xf32>
    %160 = arith.select %14, %154, %159 : vector<8x128xi1>, vector<8x128xf32>
    %c96_i32_57 = arith.constant 96 : i32
    %161 = tpu.dynamic_rotate %160 by %c96_i32_57 dim 1 : vector<8x128xf32>, i32 -> vector<8x128xf32>
    %c64_i32_58 = arith.constant 64 : i32
    %162 = tpu.dynamic_rotate %160 by %c64_i32_58 dim 1 : vector<8x128xf32>, i32 -> vector<8x128xf32>
    %c32_i32_59 = arith.constant 32 : i32
    %163 = tpu.dynamic_rotate %160 by %c32_i32_59 dim 1 : vector<8x128xf32>, i32 -> vector<8x128xf32>
    %164 = arith.mulf %161, %146 : vector<8x128xf32>
    %165 = arith.mulf %160, %162 : vector<8x128xf32>
    %166 = arith.addf %164, %165 : vector<8x128xf32>
    %cst_60 = arith.constant 0.000000e+00 : f32
    %167 = vector.broadcast %cst_60 : f32 to vector<8x128xf32>
    %168 = arith.select %16, %166, %167 : vector<8x128xi1>, vector<8x128xf32>
    %169 = math.tanh %168 : vector<8x128xf32>
    %170 = arith.mulf %163, %169 : vector<8x128xf32>
    %cst_61 = arith.constant 0.000000e+00 : f32
    %171 = vector.broadcast %cst_61 : f32 to vector<8x128xf32>
    %172 = arith.select %16, %170, %171 : vector<8x128xi1>, vector<8x128xf32>
    %173 = vector.extract_strided_slice %8 {offsets = [56, 0], sizes = [8, 128], strides = [1, 1]} : vector<64x128xf32> to vector<8x128xf32>
    %cst_62 = arith.constant dense<0.000000e+00> : vector<8x128xf32>
    %174 = tpu.matmul %172, %1, %cst_62 {dimension_numbers = #tpu.dot_dimension_numbers<[1], [0], [0], [1], [0, 0, 1, 1], [], []>} : vector<8x128xf32>, vector<128x128xf32>, vector<8x128xf32> -> vector<8x128xf32>
    %175 = arith.addf %173, %174 : vector<8x128xf32>
    %176 = math.tanh %175 : vector<8x128xf32>
    %177 = arith.negf %175 : vector<8x128xf32>
    %178 = math.exp %177 : vector<8x128xf32>
    %cst_63 = arith.constant 1.000000e+00 : f32
    %179 = vector.broadcast %cst_63 : f32 to vector<8x128xf32>
    %180 = arith.addf %179, %178 : vector<8x128xf32>
    %181 = arith.divf %179, %180 : vector<8x128xf32>
    %182 = arith.select %14, %176, %181 : vector<8x128xi1>, vector<8x128xf32>
    %c96_i32_64 = arith.constant 96 : i32
    %183 = tpu.dynamic_rotate %182 by %c96_i32_64 dim 1 : vector<8x128xf32>, i32 -> vector<8x128xf32>
    %c64_i32_65 = arith.constant 64 : i32
    %184 = tpu.dynamic_rotate %182 by %c64_i32_65 dim 1 : vector<8x128xf32>, i32 -> vector<8x128xf32>
    %c32_i32_66 = arith.constant 32 : i32
    %185 = tpu.dynamic_rotate %182 by %c32_i32_66 dim 1 : vector<8x128xf32>, i32 -> vector<8x128xf32>
    %186 = arith.mulf %183, %168 : vector<8x128xf32>
    %187 = arith.mulf %182, %184 : vector<8x128xf32>
    %188 = arith.addf %186, %187 : vector<8x128xf32>
    %cst_67 = arith.constant 0.000000e+00 : f32
    %189 = vector.broadcast %cst_67 : f32 to vector<8x128xf32>
    %190 = arith.select %16, %188, %189 : vector<8x128xi1>, vector<8x128xf32>
    %191 = math.tanh %190 : vector<8x128xf32>
    %192 = arith.mulf %185, %191 : vector<8x128xf32>
    %cst_68 = arith.constant 0.000000e+00 : f32
    %193 = vector.broadcast %cst_68 : f32 to vector<8x128xf32>
    %194 = arith.select %16, %192, %193 : vector<8x128xi1>, vector<8x128xf32>
    %cst_69 = arith.constant dense<0.000000e+00> : vector<8x128xf32>
    %195 = tpu.matmul %194, %2, %cst_69 {dimension_numbers = #tpu.dot_dimension_numbers<[1], [0], [0], [1], [0, 0, 1, 1], [], []>} : vector<8x128xf32>, vector<128x128xf32>, vector<8x128xf32> -> vector<8x128xf32>
    %196 = vector.broadcast %4 : vector<1x128xf32> to vector<8x128xf32>
    %197 = arith.addf %195, %196 : vector<8x128xf32>
    %cst_70 = arith.constant dense<0xFF800000> : vector<8xf32>
    %198 = vector.multi_reduction <maximumf>, %197, %cst_70 [1] : vector<8x128xf32> to vector<8xf32>
    %199 = vector.shape_cast %198 : vector<8xf32> to vector<8x1xf32>
    %200 = vector.broadcast %199 : vector<8x1xf32> to vector<8x128xf32>
    %201 = arith.subf %197, %200 : vector<8x128xf32>
    %202 = math.exp %201 : vector<8x128xf32>
    %cst_71 = arith.constant dense<0.000000e+00> : vector<8xf32>
    %203 = vector.multi_reduction <add>, %202, %cst_71 [1] : vector<8x128xf32> to vector<8xf32>
    %204 = vector.shape_cast %203 : vector<8xf32> to vector<8x1xf32>
    %205 = math.log %204 : vector<8x1xf32>
    %206 = vector.broadcast %205 : vector<8x1xf32> to vector<8x128xf32>
    %207 = arith.subf %201, %206 : vector<8x128xf32>
    %c0_72 = arith.constant 0 : index
    %c0_73 = arith.constant 0 : index
    %208 = vector.load %arg7[%c0_72, %c0_73] : memref<8x128xf32, #tpu.memory_space<vmem>>, vector<8x128xf32>
    tpu.vector_store %arg7[%c0_72, %c0_73], %207 {strides = array<i32>} : memref<8x128xf32, #tpu.memory_space<vmem>>, vector<8x128xf32>,
    return
  }
  func.func @transform_0(%arg0: i32) -> (i32, i32) {
    %c0_i32 = arith.constant 0 : i32
    %c0_i32_0 = arith.constant 0 : i32
    %c0_i32_1 = arith.constant 0 : i32
    return %c0_i32, %c0_i32_0 : i32, i32
  }
  func.func @transform_1(%arg0: i32) -> (i32, i32) {
    %c0_i32 = arith.constant 0 : i32
    %c0_i32_0 = arith.constant 0 : i32
    %c0_i32_1 = arith.constant 0 : i32
    return %c0_i32, %c0_i32_0 : i32, i32
  }
  func.func @transform_2(%arg0: i32) -> (i32, i32) {
    %c0_i32 = arith.constant 0 : i32
    %c0_i32_0 = arith.constant 0 : i32
    %c0_i32_1 = arith.constant 0 : i32
    return %c0_i32, %c0_i32_0 : i32, i32
  }
  func.func @transform_3(%arg0: i32) -> (i32, i32) {
    %c0_i32 = arith.constant 0 : i32
    %c0_i32_0 = arith.constant 0 : i32
    %c0_i32_1 = arith.constant 0 : i32
    return %c0_i32, %c0_i32_0 : i32, i32
  }
  func.func @transform_4(%arg0: i32) -> (i32, i32) {
    %c0_i32 = arith.constant 0 : i32
    %c0_i32_0 = arith.constant 0 : i32
    %c0_i32_1 = arith.constant 0 : i32
    return %c0_i32, %c0_i32_0 : i32, i32
  }
  func.func @transform_5(%arg0: i32) -> (i32, i32) {
    %c0_i32 = arith.constant 0 : i32
    %c0_i32_0 = arith.constant 0 : i32
    %c0_i32_1 = arith.constant 0 : i32
    return %c0_i32, %c0_i32_0 : i32, i32
  }
  func.func @transform_6(%arg0: i32) -> (i32, i32) {
    %c0_i32 = arith.constant 0 : i32
    %c0_i32_0 = arith.constant 0 : i32
    %c0_i32_1 = arith.constant 0 : i32
    return %c0_i32, %c0_i32_0 : i32, i32
  }
}

</mosaic_0001>

<bundles_post_ra>
// kernel: tpu_custom_call.1
= control target key start
LH: loop header
LB: loop body
LE: loop exit
PB: predicated region body
PF: predicated region fallthrough
CT: control target
= control target key end

     0   :  { %11 = vsyncpa [#allocation3], 0  ;;  %s1200_s0 = inlined_call_operand.vmem [shape: f32[64,16], index: 0, kind: input, shape index: {}]   ;;  %s1201_s1 = inlined_call_operand.vmem [shape: f32[16,128], index: 1, kind: input, shape index: {}]   ;;  %s1202_s2 = inlined_call_operand.hbm [shape: f32[128,128], index: 2, kind: input, shape index: {}]   ;;  %s1203_s3 = inlined_call_operand.vmem [shape: f32[1,128], index: 3, kind: input, shape index: {}]   ;;  %s1204_s4 = inlined_call_operand.hbm [shape: f32[128,128], index: 4, kind: input, shape index: {}]   ;;  %s1205_s5 = inlined_call_operand.vmem [shape: f32[1,128], index: 5, kind: input, shape index: {}]   ;;  %s1206_s6 = inlined_call_operand.hbm [shape: f32[8,128], index: 6, kind: output, shape index: {}]  }
   0x1   :  { %12 = vsyncpa [#allocation6], 0 }
   0x2   :  { %13 = vsyncpa [#allocation4], 0  ;;  %s22_s23 = sshll.u32 %s1202_s2, 4  ;;  %s848_s24 = smov [#allocation2]   ;;  %s23_s23 = int_to_ptr.hbm [resolvable:$true] %s22_s23 }
   0x3   :  { %s24_s25 = sshll.u32 %s848_s24, 4  ;;  %s37_s28 = sshll.u32 %s1204_s4, 4  ;;  %s25_s25 = int_to_ptr.vmem [resolvable:$true] %s24_s25  ;;  %s38_s28 = int_to_ptr.hbm [resolvable:$true] %s37_s28 }
   0x4   :  { %s849_s29 = smov 128   ;;  %s850_s30 = smov 8  }
   0x5   :  { %30 = dma.hbm_to_vmem [thread:$0]  %s23_s23, 2048, %s25_s25, [#allocation3], %s849_s29, %s849_s29, %s850_s30  }
   0x6   :  { %s851_s7 = smov [#allocation5]  }
   0x7   :  { %s39_s8 = sshll.u32 %s851_s7, 4  ;;  %s40_s8 = int_to_ptr.vmem [resolvable:$true] %s39_s8 }
   0x8   :  { %45 = dma.hbm_to_vmem [thread:$0]  %s38_s28, 2048, %s40_s8, [#allocation6], %s849_s29, %s849_s29, %s850_s30  }
   0x9   :  { %842 = dma.done.wait [#allocation3], 2048  }
   0xa   :  { %843 = vsyncadd [#allocation3], 4294965248 }
   0xb   :  { %844 = dma.done.wait [#allocation6], 2048  }
   0xc   :  { %845 = vsyncadd [#allocation6], 4294965248  ;;  %v898_v0 = vld [vmem:[#allocation2 + $0x78] sm:$0xff]  ;;  %v900_v1 = vld [vmem:[#allocation2 + $0x70] sm:$0xff]  ;;  %vm103_vm0 = vcmask 130048   ;;  %v852_v19 = vmov 0.0   ;;  %v169_v28 = vlaneseq }
   0xd   :  { %175 = vmatpush.msra.mxu1 %v898_v0  ;;  %230 = vmatpush.msra.mxu2 %v898_v0  ;;  %v904_v2 = vld [vmem:[#allocation2 + $0x68] sm:$0xff]  ;;  %v909_v3 = vld [vmem:[#allocation2 + $0x60] sm:$0xff]  ;;  %v922_v7 = vld [vmem:[#allocation2 + $0x58] sm:$0xff]  ;;  %s854_s14 = smov 96   ;;  %s855_s15 = smov 64  }
   0xe   :  { %285 = vmatpush.msra.mxu3 %v898_v0  ;;  %v57_v4 = vld [vmem:[%s1201_s1 + $0x8] sm:$0xff]  ;;  %v56_v5 = vld [vmem:[%s1201_s1] sm:$0xff]  ;;  %v927_v8 = vld [vmem:[#allocation2 + $0x50] sm:$0xff]  ;;  %v1074_v30 = vand.u32 127, %v169_v28  ;;  %s856_s7 = smov [#allocation7]   ;;  %s656_s9 = sshll.u32 %s1206_s6, 4  ;;  %s657_s9 = int_to_ptr.hbm [resolvable:$true] %s656_s9 }
   0xf   :  { %176 = vmatpush.msra.mxu1 %v900_v1  ;;  %231 = vmatpush.msra.mxu2 %v900_v1  ;;  %v92_v6 = vld [vmem:[%s1200_s0] sm:$0xff]  ;;  %v933_v9 = vld [vmem:[#allocation2 + $0x48] sm:$0xff]  ;;  %v945_v11 = vld [vmem:[#allocation2 + $0x38] sm:$0xff]  ;;  %s654_s8 = sshll.u32 %s856_s7, 4  ;;  %s655_s8 = int_to_ptr.vmem [resolvable:$true] %s654_s8 }
  0x10   :  { %286 = vmatpush.msra.mxu3 %v900_v1  ;;  %142 = vmatpush.msra.mxu0 %v57_v4  ;;  %v939_v10 = vld [vmem:[#allocation2 + $0x40] sm:$0xff]  ;;  %v951_v12 = vld [vmem:[#allocation2 + $0x30] sm:$0xff]  ;;  %v957_v13 = vld [vmem:[#allocation2 + $0x28] sm:$0xff]  ;;  %vm171_vm1 = vcmp.ge.s32.totalorder %v1074_v30, 64  ;;  %vm172_vm2 = vcmp.lt.s32.totalorder %v1074_v30, 96  ;;  %vm174_vm8 = vcmp.lt.s32.totalorder %v1074_v30, 32 }
  0x11   :  { %177 = vmatpush.msra.mxu1 %v904_v2  ;;  %232 = vmatpush.msra.mxu2 %v904_v2  ;;  %v963_v14 = vld [vmem:[#allocation2 + $0x20] sm:$0xff]  ;;  %v969_v15 = vld [vmem:[#allocation2 + $0x18] sm:$0xff]  ;;  %v975_v16 = vld [vmem:[#allocation2 + $0x10] sm:$0xff] }
  0x12   :  { %287 = vmatpush.msra.mxu3 %v904_v2  ;;  %143 = vmatpush.msra.mxu0 %v56_v5  ;;  %v981_v17 = vld [vmem:[#allocation2 + $0x8] sm:$0xff]  ;;  %v987_v18 = vld [vmem:[#allocation2] sm:$0xff]  ;;  %vm1078_vm4 = vmand %vm171_vm1, %vm172_vm2 }
  0x13   :  { %178 = vmatpush.msra.mxu1 %v909_v3  ;;  %667 = vmatmul.msk.f32.vlgmr.msra.gmra.mxu0 %vm103_vm0, %v92_v6  ;;  %v1071_v20 = vld [vmem:[%s1203_s3] ss:$0 sm:$0xff]  ;;  %s853_s3 = smov 32   ;;  %v93_v43 = vld [vmem:[%s1200_s0 + $0x8] sm:$0xff] }
  0x14   :  { %233 = vmatpush.msra.mxu2 %v909_v3  ;;  %288 = vmatpush.msra.mxu3 %v909_v3  ;;  %v82_v36 = vld [vmem:[#allocation5 + $0x40] sm:$0xff] }
  0x15   :  { %179 = vmatpush.msra.mxu1 %v922_v7  ;;  %505 = vmatpush.msrb.mxu0 %v898_v0 }
  0x16   :  { %234 = vmatpush.msra.mxu2 %v922_v7  ;;  %289 = vmatpush.msra.mxu3 %v922_v7 }
  0x17   :  { %180 = vmatpush.msra.mxu1 %v927_v8  ;;  %506 = vmatpush.msrb.mxu0 %v900_v1 }
  0x18   :  { %235 = vmatpush.msra.mxu2 %v927_v8  ;;  %290 = vmatpush.msra.mxu3 %v927_v8 }
  0x19   :  { %181 = vmatpush.msra.mxu1 %v933_v9  ;;  %507 = vmatpush.msrb.mxu0 %v904_v2 }
  0x1a   :  { %236 = vmatpush.msra.mxu2 %v933_v9  ;;  %291 = vmatpush.msra.mxu3 %v933_v9 }
  0x1b   :  { %182 = vmatpush.msra.mxu1 %v939_v10  ;;  %508 = vmatpush.msrb.mxu0 %v909_v3 }
  0x1c   :  { %237 = vmatpush.msra.mxu2 %v939_v10  ;;  %292 = vmatpush.msra.mxu3 %v939_v10 }
  0x1d   :  { %183 = vmatpush.msra.mxu1 %v945_v11  ;;  %509 = vmatpush.msrb.mxu0 %v922_v7 }
  0x1e   :  { %238 = vmatpush.msra.mxu2 %v945_v11  ;;  %293 = vmatpush.msra.mxu3 %v945_v11 }
  0x1f   :  { %184 = vmatpush.msra.mxu1 %v951_v12  ;;  %510 = vmatpush.msrb.mxu0 %v927_v8 }
  0x20   :  { %239 = vmatpush.msra.mxu2 %v951_v12  ;;  %294 = vmatpush.msra.mxu3 %v951_v12 }
  0x21   :  { %185 = vmatpush.msra.mxu1 %v957_v13  ;;  %511 = vmatpush.msrb.mxu0 %v933_v9 }
  0x22   :  { %240 = vmatpush.msra.mxu2 %v957_v13  ;;  %295 = vmatpush.msra.mxu3 %v957_v13 }
  0x23   :  { %186 = vmatpush.msra.mxu1 %v963_v14  ;;  %512 = vmatpush.msrb.mxu0 %v939_v10 }
  0x24   :  { %241 = vmatpush.msra.mxu2 %v963_v14  ;;  %296 = vmatpush.msra.mxu3 %v963_v14 }
  0x25   :  { %187 = vmatpush.msra.mxu1 %v969_v15  ;;  %513 = vmatpush.msrb.mxu0 %v945_v11 }
  0x26   :  { %242 = vmatpush.msra.mxu2 %v969_v15  ;;  %297 = vmatpush.msra.mxu3 %v969_v15 }
  0x27   :  { %188 = vmatpush.msra.mxu1 %v975_v16  ;;  %514 = vmatpush.msrb.mxu0 %v951_v12 }
  0x28   :  { %243 = vmatpush.msra.mxu2 %v975_v16  ;;  %298 = vmatpush.msra.mxu3 %v975_v16 }
  0x29   :  { %189 = vmatpush.msra.mxu1 %v981_v17  ;;  %515 = vmatpush.msrb.mxu0 %v957_v13 }
  0x2a   :  { %244 = vmatpush.msra.mxu2 %v981_v17  ;;  %299 = vmatpush.msra.mxu3 %v981_v17 }
  0x2b   :  { %190 = vmatpush.msra.mxu1 %v987_v18  ;;  %516 = vmatpush.msrb.mxu0 %v963_v14 }
  0x2c   :  { %191 = vmatmul.f32.vlgmr.msra.gmra.mxu1 %v852_v19  ;;  %245 = vmatpush.msra.mxu2 %v987_v18 }
  0x2d   :  { %300 = vmatpush.msra.mxu3 %v987_v18  ;;  %340 = vmatpush.msrb.mxu1 %v898_v0 }
  0x2e   :  { %395 = vmatpush.msrb.mxu2 %v898_v0  ;;  %517 = vmatpush.msrb.mxu0 %v969_v15 }
  0x2f   :  { %450 = vmatpush.msrb.mxu3 %v898_v0  ;;  %341 = vmatpush.msrb.mxu1 %v900_v1 }
  0x30   :  { %396 = vmatpush.msrb.mxu2 %v900_v1  ;;  %518 = vmatpush.msrb.mxu0 %v975_v16 }
  0x31   :  { %451 = vmatpush.msrb.mxu3 %v900_v1  ;;  %342 = vmatpush.msrb.mxu1 %v904_v2 }
  0x32   :  { %397 = vmatpush.msrb.mxu2 %v904_v2  ;;  %519 = vmatpush.msrb.mxu0 %v981_v17 }
  0x33   :  { %452 = vmatpush.msrb.mxu3 %v904_v2  ;;  %343 = vmatpush.msrb.mxu1 %v909_v3 }
  0x34   :  { %398 = vmatpush.msrb.mxu2 %v909_v3  ;;  %520 = vmatpush.msrb.mxu0 %v987_v18 }
  0x35   :  { %453 = vmatpush.msrb.mxu3 %v909_v3  ;;  %344 = vmatpush.msrb.mxu1 %v922_v7 }
  0x36   :  { %399 = vmatpush.msrb.mxu2 %v922_v7  ;;  %668 = vmatmul.msk.f32.gmra.mxu0 %vm103_vm0, %v93_v43 }
  0x37   :  { %454 = vmatpush.msrb.mxu3 %v922_v7  ;;  %345 = vmatpush.msrb.mxu1 %v927_v8 }
  0x38   :  { %400 = vmatpush.msrb.mxu2 %v927_v8 }
  0x39   :  { %455 = vmatpush.msrb.mxu3 %v927_v8  ;;  %346 = vmatpush.msrb.mxu1 %v933_v9 }
  0x3a   :  { %401 = vmatpush.msrb.mxu2 %v933_v9 }
  0x3b   :  { %456 = vmatpush.msrb.mxu3 %v933_v9  ;;  %347 = vmatpush.msrb.mxu1 %v939_v10 }
  0x3c   :  { %402 = vmatpush.msrb.mxu2 %v939_v10 }
  0x3d   :  { %457 = vmatpush.msrb.mxu3 %v939_v10  ;;  %348 = vmatpush.msrb.mxu1 %v945_v11 }
  0x3e   :  { %403 = vmatpush.msrb.mxu2 %v945_v11 }
  0x3f   :  { %458 = vmatpush.msrb.mxu3 %v945_v11  ;;  %349 = vmatpush.msrb.mxu1 %v951_v12 }
  0x40   :  { %404 = vmatpush.msrb.mxu2 %v951_v12 }
  0x41   :  { %459 = vmatpush.msrb.mxu3 %v951_v12  ;;  %350 = vmatpush.msrb.mxu1 %v957_v13 }
  0x42   :  { %405 = vmatpush.msrb.mxu2 %v957_v13 }
  0x43   :  { %460 = vmatpush.msrb.mxu3 %v957_v13  ;;  %351 = vmatpush.msrb.mxu1 %v963_v14 }
  0x44   :  { %406 = vmatpush.msrb.mxu2 %v963_v14 }
  0x45   :  { %461 = vmatpush.msrb.mxu3 %v963_v14  ;;  %352 = vmatpush.msrb.mxu1 %v969_v15 }
  0x46   :  { %407 = vmatpush.msrb.mxu2 %v969_v15 }
  0x47   :  { %462 = vmatpush.msrb.mxu3 %v969_v15  ;;  %353 = vmatpush.msrb.mxu1 %v975_v16 }
  0x48   :  { %408 = vmatpush.msrb.mxu2 %v975_v16 }
  0x49   :  { %463 = vmatpush.msrb.mxu3 %v975_v16  ;;  %354 = vmatpush.msrb.mxu1 %v981_v17 }
  0x4a   :  { %409 = vmatpush.msrb.mxu2 %v981_v17 }
  0x4b   :  { %464 = vmatpush.msrb.mxu3 %v981_v17  ;;  %355 = vmatpush.msrb.mxu1 %v987_v18 }
  0x4c   :  { %410 = vmatpush.msrb.mxu2 %v987_v18 }
  0x4d   :  { %465 = vmatpush.msrb.mxu3 %v987_v18  ;;  %560 = vmatpush.msra.mxu1 %v898_v0 }
  0x4f   :  { %561 = vmatpush.msra.mxu1 %v900_v1 }
  0x51   :  { %562 = vmatpush.msra.mxu1 %v904_v2 }
  0x53   :  { %563 = vmatpush.msra.mxu1 %v909_v3 }
  0x55   :  { %564 = vmatpush.msra.mxu1 %v922_v7 }
  0x57   :  { %565 = vmatpush.msra.mxu1 %v927_v8  ;;  %v94_v8 = vld [vmem:[%s1200_s0 + $0x10] sm:$0xff] }
  0x58   :  { %669 = vmatmul.msk.f32.gmra.mxu0 %vm103_vm0, %v94_v8 }
  0x59   :  { %566 = vmatpush.msra.mxu1 %v933_v9 }
  0x5b   :  { %567 = vmatpush.msra.mxu1 %v939_v10 }
  0x5d   :  { %568 = vmatpush.msra.mxu1 %v945_v11 }
  0x5f   :  { %569 = vmatpush.msra.mxu1 %v951_v12 }
  0x61   :  { %570 = vmatpush.msra.mxu1 %v957_v13 }
  0x63   :  { %571 = vmatpush.msra.mxu1 %v963_v14 }
  0x65   :  { %572 = vmatpush.msra.mxu1 %v969_v15 }
  0x67   :  { %573 = vmatpush.msra.mxu1 %v975_v16 }
  0x69   :  { %574 = vmatpush.msra.mxu1 %v981_v17 }
  0x6b   :  { %575 = vmatpush.msra.mxu1 %v987_v18 }
  0x90   :  { %v145_v21 = vpop.f32.mrf.mxu0 }
  0x91   :  { %v146_v22 = vadd.f32 %v1071_v20, %v145_v21 }
  0xa9   :  { %v192_v23 = vpop.f32.mrf.mxu1 }
  0xaa   :  { %v195_v24 = vadd.f32 %v192_v23, %v146_v22 }
  0xac   :  { %v675_v25 = vmul.f32 -1.442695, %v195_v24 }
  0xae   :  { %702 = vpow2.f32 %v675_v25 }
  0xb3   :  { %v148_v53 = vpop.f32.mrf.mxu0 }
  0xb4   :  { %v703_v26 = vpop.eup %702  ;;  %v149_v54 = vadd.f32 %v1071_v20, %v148_v53 }
  0xb5   :  { %v200_v27 = vadd.f32 1.0, %v703_v26 }
  0xb7   :  { %704 = vrcp.f32 %v200_v27  ;;  %v212_v33 = vand.u32 2147483648, %v200_v27  ;;  %v210_v35 = vand.u32 2147483647, %v200_v27  ;;  %vm206_vm5 = vweird.f32 %v200_v27 }
  0xb8   :  { %706 = vtanh.f32 %v195_v24 }
  0xb9   :  { %v213_v38 = vor.u32 1.1754944e-38, %v212_v33  ;;  %vm211_vm7 = vcmp.eq.f32.partialorder %v210_v35, 8.507059e+37 }
  0xbd   :  { %v705_v29 = vpop.eup %704 }
  0xbe   :  { %v202_v31 = vmul.f32 %v705_v29, %v200_v27  ;;  %vm207_vm3 = vweird.f32 %v705_v29  ;;  %v707_v40 = vpop.eup %706 }
  0xbf   :  { %vm208_vm6 = vmor %vm206_vm5, %vm207_vm3 }
  0xc0   :  { %v203_v32 = vsub.f32 1.0, %v202_v31 }
  0xc2   :  { %v204_v34 = vmul.f32 %v705_v29, %v203_v32 }
  0xc4   :  { %v205_v37 = vadd.f32 %v705_v29, %v204_v34 }
  0xc6   :  { %v209_v39 = vsel %vm208_vm6, %v705_v29, %v205_v37 }
  0xc7   :  { %v214_v41 = vsel %vm211_vm7, %v213_v38, %v209_v39 }
  0xc8   :  { %v216_v42 = vsel %vm1078_vm4, %v707_v40, %v214_v41  ;;  %v95_v40 = vld [vmem:[%s1200_s0 + $0x18] sm:$0xff] }
  0xc9   :  { %221 = vrot.lane.b32.xlu1 %v216_v42, %s853_s3  ;;  %217 = vrot.lane.b32.xlu0 %v216_v42, %s854_s14 }
  0xca   :  { %670 = vmatmul.msk.f32.gmra.mxu0 %vm103_vm0, %v95_v40 }
  0xd1   :  { %219 = vrot.lane.b32.xlu0 %v216_v42, %s855_s15 }
  0xd5   :  { %v151_v18 = vpop.f32.mrf.mxu0 }
  0xd6   :  { %v152_v19 = vadd.f32 %v1071_v20, %v151_v18 }
 0x13b   :  { %v218_v44 = vpop.permute.xlu0 %217  ;;  %v222_v51 = vpop.permute.xlu1 %221 }
 0x13c   :  { %v223_v46 = vmul.f32 0.0, %v218_v44 }
 0x143   :  { %v220_v45 = vpop.permute.xlu0 %219 }
 0x144   :  { %v224_v47 = vmul.f32 %v220_v45, %v216_v42 }
 0x146   :  { %v225_v48 = vadd.f32 %v224_v47, %v223_v46 }
 0x148   :  { %v226_v49 = vsel %vm174_vm8, %v225_v48, 0.0 }
 0x149   :  { %708 = vtanh.f32 %v226_v49 }
 0x14f   :  { %v709_v50 = vpop.eup %708 }
 0x150   :  { %v228_v52 = vmul.f32 %v709_v50, %v222_v51  ;;  %v154_v50 = vpop.f32.mrf.mxu0 }
 0x151   :  { %v155_v51 = vadd.f32 %v1071_v20, %v154_v50 }
 0x152   :  { %676 = vmatmul.msk.f32.vlgmr.msra.gmra.mxu2 %vm174_vm8, %v228_v52 }
 0x1d5   :  { %v247_v55 = vpop.f32.mrf.mxu2 }
 0x1d6   :  { %v250_v56 = vadd.f32 %v247_v55, %v149_v54 }
 0x1d8   :  { %v677_v57 = vmul.f32 -1.442695, %v250_v56 }
 0x1da   :  { %710 = vpow2.f32 %v677_v57 }
 0x1e0   :  { %v711_v58 = vpop.eup %710 }
 0x1e1   :  { %v255_v59 = vadd.f32 1.0, %v711_v58 }
 0x1e3   :  { %712 = vrcp.f32 %v255_v59  ;;  %v267_v63 = vand.u32 2147483648, %v255_v59  ;;  %v265_v1 = vand.u32 2147483647, %v255_v59  ;;  %vm261_vm10 = vweird.f32 %v255_v59 }
 0x1e4   :  { %714 = vtanh.f32 %v250_v56 }
 0x1e5   :  { %v268_v3 = vor.u32 1.1754944e-38, %v267_v63  ;;  %vm266_vm12 = vcmp.eq.f32.partialorder %v265_v1, 8.507059e+37 }
 0x1e9   :  { %v713_v60 = vpop.eup %712 }
 0x1ea   :  { %v257_v61 = vmul.f32 %v713_v60, %v255_v59  ;;  %vm262_vm9 = vweird.f32 %v713_v60  ;;  %v715_v5 = vpop.eup %714 }
 0x1eb   :  { %vm263_vm11 = vmor %vm261_vm10, %vm262_vm9 }
 0x1ec   :  { %v258_v62 = vsub.f32 1.0, %v257_v61 }
 0x1ee   :  { %v259_v0 = vmul.f32 %v713_v60, %v258_v62 }
 0x1f0   :  { %v260_v2 = vadd.f32 %v713_v60, %v259_v0 }
 0x1f2   :  { %v264_v4 = vsel %vm263_vm11, %v713_v60, %v260_v2 }
 0x1f3   :  { %v269_v6 = vsel %vm266_vm12, %v268_v3, %v264_v4 }
 0x1f4   :  { %v271_v7 = vsel %vm1078_vm4, %v715_v5, %v269_v6  ;;  %v96_v5 = vld [vmem:[%s1200_s0 + $0x20] sm:$0xff] }
 0x1f5   :  { %274 = vrot.lane.b32.xlu2 %v271_v7, %s855_s15  ;;  %272 = vrot.lane.b32.xlu1 %v271_v7, %s854_s14 }
 0x1f6   :  { %671 = vmatmul.msk.f32.gmra.mxu0 %vm103_vm0, %v96_v5 }
 0x1fd   :  { %276 = vrot.lane.b32.xlu2 %v271_v7, %s853_s3 }
 0x24f   :  { %v275_v9 = vpop.permute.xlu2 %274 }
 0x250   :  { %v279_v11 = vmul.f32 %v275_v9, %v271_v7 }
 0x257   :  { %v277_v16 = vpop.permute.xlu2 %276 }
 0x267   :  { %v273_v10 = vpop.permute.xlu1 %272 }
 0x268   :  { %v278_v12 = vmul.f32 %v273_v10, %v226_v49 }
 0x26a   :  { %v280_v13 = vadd.f32 %v279_v11, %v278_v12 }
 0x26c   :  { %v281_v14 = vsel %vm174_vm8, %v280_v13, 0.0 }
 0x26d   :  { %716 = vtanh.f32 %v281_v14 }
 0x273   :  { %v717_v15 = vpop.eup %716 }
 0x274   :  { %v283_v17 = vmul.f32 %v717_v15, %v277_v16  ;;  %v157_v15 = vpop.f32.mrf.mxu0 }
 0x275   :  { %v158_v16 = vadd.f32 %v1071_v20, %v157_v15 }
 0x276   :  { %678 = vmatmul.msk.f32.vlgmr.msra.gmra.mxu3 %vm174_vm8, %v283_v17 }
 0x2f9   :  { %v302_v21 = vpop.f32.mrf.mxu3 }
 0x2fa   :  { %v305_v22 = vadd.f32 %v302_v21, %v152_v19 }
 0x2fc   :  { %v679_v23 = vmul.f32 -1.442695, %v305_v22 }
 0x2fe   :  { %718 = vpow2.f32 %v679_v23 }
 0x304   :  { %v719_v24 = vpop.eup %718 }
 0x305   :  { %v310_v25 = vadd.f32 1.0, %v719_v24 }
 0x307   :  { %720 = vrcp.f32 %v310_v25  ;;  %v322_v29 = vand.u32 2147483648, %v310_v25  ;;  %v320_v32 = vand.u32 2147483647, %v310_v25  ;;  %vm316_vm14 = vweird.f32 %v310_v25 }
 0x308   :  { %722 = vtanh.f32 %v305_v22 }
 0x309   :  { %v323_v34 = vor.u32 1.1754944e-38, %v322_v29  ;;  %vm321_vm1 = vcmp.eq.f32.partialorder %v320_v32, 8.507059e+37 }
 0x30d   :  { %v721_v26 = vpop.eup %720 }
 0x30e   :  { %v312_v27 = vmul.f32 %v721_v26, %v310_v25  ;;  %vm317_vm13 = vweird.f32 %v721_v26  ;;  %v723_v37 = vpop.eup %722 }
 0x30f   :  { %vm318_vm15 = vmor %vm316_vm14, %vm317_vm13 }
 0x310   :  { %v313_v28 = vsub.f32 1.0, %v312_v27 }
 0x312   :  { %v314_v31 = vmul.f32 %v721_v26, %v313_v28 }
 0x314   :  { %v315_v33 = vadd.f32 %v721_v26, %v314_v31 }
 0x316   :  { %v319_v35 = vsel %vm318_vm15, %v721_v26, %v315_v33 }
 0x317   :  { %v324_v38 = vsel %vm321_vm1, %v323_v34, %v319_v35 }
 0x318   :  { %v326_v39 = vsel %vm1078_vm4, %v723_v37, %v324_v38  ;;  %v97_v37 = vld [vmem:[%s1200_s0 + $0x28] sm:$0xff] }
 0x319   :  { %331 = vrot.lane.b32.xlu2 %v326_v39, %s853_s3  ;;  %329 = vrot.lane.b32.xlu1 %v326_v39, %s855_s15 }
 0x31a   :  { %327 = vrot.lane.b32.xlu0 %v326_v39, %s854_s14  ;;  %672 = vmatmul.msk.f32.gmra.mxu0 %vm103_vm0, %v97_v37 }
 0x373   :  { %v332_v48 = vpop.permute.xlu2 %331 }
 0x38b   :  { %v330_v41 = vpop.permute.xlu1 %329 }
 0x38c   :  { %v334_v42 = vmul.f32 %v330_v41, %v326_v39  ;;  %v328_v43 = vpop.permute.xlu0 %327 }
 0x38d   :  { %v333_v44 = vmul.f32 %v328_v43, %v281_v14 }
 0x38f   :  { %v335_v45 = vadd.f32 %v334_v42, %v333_v44 }
 0x391   :  { %v336_v46 = vsel %vm174_vm8, %v335_v45, 0.0 }
 0x392   :  { %724 = vtanh.f32 %v336_v46 }
 0x398   :  { %v725_v47 = vpop.eup %724 }
 0x399   :  { %v338_v49 = vmul.f32 %v725_v47, %v332_v48  ;;  %v160_v47 = vpop.f32.mrf.mxu0 }
 0x39a   :  { %v161_v48 = vadd.f32 %v1071_v20, %v160_v47 }
 0x39b   :  { %680 = vmatmul.msk.f32.vlgmr.msrb.gmra.mxu1 %vm174_vm8, %v338_v49 }
 0x418   :  { %v357_v52 = vpop.f32.mrf.mxu1 }
 0x419   :  { %v360_v53 = vadd.f32 %v357_v52, %v155_v51 }
 0x41b   :  { %v681_v54 = vmul.f32 -1.442695, %v360_v53 }
 0x41d   :  { %726 = vpow2.f32 %v681_v54 }
 0x423   :  { %v727_v55 = vpop.eup %726 }
 0x424   :  { %v365_v56 = vadd.f32 1.0, %v727_v55 }
 0x426   :  { %728 = vrcp.f32 %v365_v56  ;;  %v377_v60 = vand.u32 2147483648, %v365_v56  ;;  %v375_v62 = vand.u32 2147483647, %v365_v56  ;;  %vm371_vm3 = vweird.f32 %v365_v56 }
 0x427   :  { %730 = vtanh.f32 %v360_v53 }
 0x428   :  { %v378_v0 = vor.u32 1.1754944e-38, %v377_v60  ;;  %vm376_vm6 = vcmp.eq.f32.partialorder %v375_v62, 8.507059e+37 }
 0x42c   :  { %v729_v57 = vpop.eup %728 }
 0x42d   :  { %v367_v58 = vmul.f32 %v729_v57, %v365_v56  ;;  %vm372_vm2 = vweird.f32 %v729_v57  ;;  %v731_v2 = vpop.eup %730 }
 0x42e   :  { %vm373_vm5 = vmor %vm371_vm3, %vm372_vm2 }
 0x42f   :  { %v368_v59 = vsub.f32 1.0, %v367_v58 }
 0x431   :  { %v369_v61 = vmul.f32 %v729_v57, %v368_v59 }
 0x433   :  { %v370_v63 = vadd.f32 %v729_v57, %v369_v61 }
 0x435   :  { %v374_v1 = vsel %vm373_vm5, %v729_v57, %v370_v63 }
 0x436   :  { %v379_v3 = vsel %vm376_vm6, %v378_v0, %v374_v1 }
 0x437   :  { %v381_v4 = vsel %vm1078_vm4, %v731_v2, %v379_v3  ;;  %v98_v2 = vld [vmem:[%s1200_s0 + $0x30] sm:$0xff]  ;;  %v99_v3 = vld [vmem:[%s1200_s0 + $0x38] sm:$0xff] }
 0x438   :  { %386 = vrot.lane.b32.xlu2 %v381_v4, %s853_s3  ;;  %384 = vrot.lane.b32.xlu1 %v381_v4, %s855_s15 }
 0x439   :  { %382 = vrot.lane.b32.xlu0 %v381_v4, %s854_s14  ;;  %673 = vmatmul.msk.f32.gmra.mxu0 %vm103_vm0, %v98_v2  ;;  %v85_v2 = vld [vmem:[#allocation5 + $0x58] sm:$0xff] }
 0x441   :  { %674 = vmatmul.msk.f32.gmra.mxu0 %vm103_vm0, %v99_v3  ;;  %v84_v3 = vld [vmem:[#allocation5 + $0x50] sm:$0xff] }
 0x492   :  { %v387_v13 = vpop.permute.xlu2 %386 }
 0x4aa   :  { %v385_v6 = vpop.permute.xlu1 %384 }
 0x4ab   :  { %v389_v7 = vmul.f32 %v385_v6, %v381_v4  ;;  %v383_v8 = vpop.permute.xlu0 %382 }
 0x4ac   :  { %v388_v9 = vmul.f32 %v383_v8, %v336_v46 }
 0x4ae   :  { %v390_v10 = vadd.f32 %v389_v7, %v388_v9 }
 0x4b0   :  { %v391_v11 = vsel %vm174_vm8, %v390_v10, 0.0 }
 0x4b1   :  { %732 = vtanh.f32 %v391_v11 }
 0x4b7   :  { %v733_v12 = vpop.eup %732 }
 0x4b8   :  { %v393_v14 = vmul.f32 %v733_v12, %v387_v13  ;;  %v163_v13 = vpop.f32.mrf.mxu0 }
 0x4b9   :  { %v164_v15 = vadd.f32 %v1071_v20, %v163_v13 }
 0x4ba   :  { %682 = vmatmul.msk.f32.vlgmr.msrb.gmra.mxu2 %vm174_vm8, %v393_v14 }
 0x4c0   :  { %v166_v14 = vpop.f32.mrf.mxu0 }
 0x53d   :  { %v412_v17 = vpop.f32.mrf.mxu2 }
 0x53e   :  { %v415_v18 = vadd.f32 %v412_v17, %v158_v16 }
 0x540   :  { %v683_v19 = vmul.f32 -1.442695, %v415_v18 }
 0x542   :  { %734 = vpow2.f32 %v683_v19 }
 0x548   :  { %v735_v21 = vpop.eup %734 }
 0x549   :  { %v420_v22 = vadd.f32 1.0, %v735_v21 }
 0x54b   :  { %736 = vrcp.f32 %v420_v22  ;;  %v432_v26 = vand.u32 2147483648, %v420_v22  ;;  %v430_v28 = vand.u32 2147483647, %v420_v22  ;;  %vm426_vm9 = vweird.f32 %v420_v22 }
 0x54c   :  { %738 = vtanh.f32 %v415_v18 }
 0x54d   :  { %v433_v31 = vor.u32 1.1754944e-38, %v432_v26  ;;  %vm431_vm11 = vcmp.eq.f32.partialorder %v430_v28, 8.507059e+37 }
 0x551   :  { %v737_v23 = vpop.eup %736 }
 0x552   :  { %v422_v24 = vmul.f32 %v737_v23, %v420_v22  ;;  %vm427_vm7 = vweird.f32 %v737_v23  ;;  %v739_v33 = vpop.eup %738 }
 0x553   :  { %vm428_vm10 = vmor %vm426_vm9, %vm427_vm7 }
 0x554   :  { %v423_v25 = vsub.f32 1.0, %v422_v24 }
 0x556   :  { %v424_v27 = vmul.f32 %v737_v23, %v423_v25 }
 0x558   :  { %v425_v29 = vadd.f32 %v737_v23, %v424_v27 }
 0x55a   :  { %v429_v32 = vsel %vm428_vm10, %v737_v23, %v425_v29 }
 0x55b   :  { %v434_v34 = vsel %vm431_vm11, %v433_v31, %v429_v32 }
 0x55c   :  { %v436_v35 = vsel %vm1078_vm4, %v739_v33, %v434_v34 }
 0x55d   :  { %441 = vrot.lane.b32.xlu2 %v436_v35, %s853_s3  ;;  %439 = vrot.lane.b32.xlu1 %v436_v35, %s855_s15 }
 0x55e   :  { %437 = vrot.lane.b32.xlu0 %v436_v35, %s854_s14 }
 0x5b7   :  { %v442_v45 = vpop.permute.xlu2 %441 }
 0x5cf   :  { %v440_v38 = vpop.permute.xlu1 %439 }
 0x5d0   :  { %v444_v39 = vmul.f32 %v440_v38, %v436_v35  ;;  %v438_v40 = vpop.permute.xlu0 %437 }
 0x5d1   :  { %v443_v41 = vmul.f32 %v438_v40, %v391_v11 }
 0x5d3   :  { %v445_v42 = vadd.f32 %v444_v39, %v443_v41 }
 0x5d5   :  { %v446_v43 = vsel %vm174_vm8, %v445_v42, 0.0 }
 0x5d6   :  { %740 = vtanh.f32 %v446_v43 }
 0x5dc   :  { %v741_v44 = vpop.eup %740 }
 0x5dd   :  { %v448_v46 = vmul.f32 %v741_v44, %v442_v45  ;;  %v167_v45 = vadd.f32 %v1071_v20, %v166_v14 }
 0x5df   :  { %684 = vmatmul.msk.f32.vlgmr.msrb.gmra.mxu3 %vm174_vm8, %v448_v46 }
 0x662   :  { %v467_v49 = vpop.f32.mrf.mxu3 }
 0x663   :  { %v470_v50 = vadd.f32 %v467_v49, %v161_v48 }
 0x665   :  { %v685_v51 = vmul.f32 -1.442695, %v470_v50 }
 0x667   :  { %742 = vpow2.f32 %v685_v51 }
 0x66d   :  { %v743_v52 = vpop.eup %742 }
 0x66e   :  { %v475_v53 = vadd.f32 1.0, %v743_v52 }
 0x670   :  { %744 = vrcp.f32 %v475_v53  ;;  %v487_v57 = vand.u32 2147483648, %v475_v53  ;;  %v485_v59 = vand.u32 2147483647, %v475_v53  ;;  %vm481_vm13 = vweird.f32 %v475_v53 }
 0x671   :  { %746 = vtanh.f32 %v470_v50 }
 0x672   :  { %v488_v61 = vor.u32 1.1754944e-38, %v487_v57  ;;  %vm486_vm15 = vcmp.eq.f32.partialorder %v485_v59, 8.507059e+37 }
 0x676   :  { %v745_v54 = vpop.eup %744 }
 0x677   :  { %v477_v55 = vmul.f32 %v745_v54, %v475_v53  ;;  %vm482_vm12 = vweird.f32 %v745_v54  ;;  %v747_v63 = vpop.eup %746 }
 0x678   :  { %vm483_vm14 = vmor %vm481_vm13, %vm482_vm12 }
 0x679   :  { %v478_v56 = vsub.f32 1.0, %v477_v55 }
 0x67b   :  { %v479_v58 = vmul.f32 %v745_v54, %v478_v56 }
 0x67d   :  { %v480_v60 = vadd.f32 %v745_v54, %v479_v58 }
 0x67f   :  { %v484_v62 = vsel %vm483_vm14, %v745_v54, %v480_v60 }
 0x680   :  { %v489_v0 = vsel %vm486_vm15, %v488_v61, %v484_v62  ;;  %v89_v62 = vld [vmem:[#allocation5 + $0x78] sm:$0xff] }
 0x681   :  { %v491_v1 = vsel %vm1078_vm4, %v747_v63, %v489_v0  ;;  %v88_v63 = vld [vmem:[#allocation5 + $0x70] sm:$0xff]  ;;  %618 = vmatpush.msra.mxu2 %v89_v62  ;;  %v87_v0 = vld [vmem:[#allocation5 + $0x68] sm:$0xff] }
 0x682   :  { %496 = vrot.lane.b32.xlu2 %v491_v1, %s853_s3  ;;  %494 = vrot.lane.b32.xlu1 %v491_v1, %s855_s15 }
 0x683   :  { %492 = vrot.lane.b32.xlu0 %v491_v1, %s854_s14  ;;  %619 = vmatpush.msra.mxu2 %v88_v63 }
 0x685   :  { %620 = vmatpush.msra.mxu2 %v87_v0 }
 0x6dc   :  { %v497_v11 = vpop.permute.xlu2 %496 }
 0x6f4   :  { %v495_v4 = vpop.permute.xlu1 %494 }
 0x6f5   :  { %v499_v5 = vmul.f32 %v495_v4, %v491_v1  ;;  %v493_v6 = vpop.permute.xlu0 %492  ;;  %v86_v1 = vld [vmem:[#allocation5 + $0x60] sm:$0xff]  ;;  %v83_v4 = vld [vmem:[#allocation5 + $0x48] sm:$0xff] }
 0x6f6   :  { %v498_v7 = vmul.f32 %v493_v6, %v446_v43  ;;  %621 = vmatpush.msra.mxu2 %v86_v1  ;;  %v80_v6 = vld [vmem:[#allocation5 + $0x30] sm:$0xff] }
 0x6f8   :  { %v500_v8 = vadd.f32 %v499_v5, %v498_v7  ;;  %622 = vmatpush.msra.mxu2 %v85_v2  ;;  %v81_v5 = vld [vmem:[#allocation5 + $0x38] sm:$0xff]  ;;  %v79_v7 = vld [vmem:[#allocation5 + $0x28] sm:$0xff] }
 0x6fa   :  { %v501_v9 = vsel %vm174_vm8, %v500_v8, 0.0  ;;  %623 = vmatpush.msra.mxu2 %v84_v3  ;;  %v78_v8 = vld [vmem:[#allocation5 + $0x20] sm:$0xff] }
 0x6fb   :  { %748 = vtanh.f32 %v501_v9 }
 0x6fc   :  { %624 = vmatpush.msra.mxu2 %v83_v4 }
 0x6fe   :  { %625 = vmatpush.msra.mxu2 %v82_v36 }
 0x700   :  { %626 = vmatpush.msra.mxu2 %v81_v5 }
 0x701   :  { %v749_v10 = vpop.eup %748 }
 0x702   :  { %v503_v12 = vmul.f32 %v749_v10, %v497_v11  ;;  %627 = vmatpush.msra.mxu2 %v80_v6  ;;  %v76_v10 = vld [vmem:[#allocation5 + $0x10] sm:$0xff]  ;;  %v75_v11 = vld [vmem:[#allocation5 + $0x8] sm:$0xff] }
 0x704   :  { %686 = vmatmul.msk.f32.vlgmr.msrb.gmra.mxu0 %vm174_vm8, %v503_v12  ;;  %628 = vmatpush.msra.mxu2 %v79_v7  ;;  %v74_v12 = vld [vmem:[#allocation5] sm:$0xff] }
 0x706   :  { %629 = vmatpush.msra.mxu2 %v78_v8 }
 0x781   :  { %v522_v16 = vpop.f32.mrf.mxu0 }
 0x782   :  { %v525_v17 = vadd.f32 %v522_v16, %v164_v15 }
 0x784   :  { %v687_v18 = vmul.f32 -1.442695, %v525_v17 }
 0x786   :  { %750 = vpow2.f32 %v687_v18 }
 0x78c   :  { %v751_v19 = vpop.eup %750 }
 0x78d   :  { %v530_v21 = vadd.f32 1.0, %v751_v19 }
 0x78f   :  { %752 = vrcp.f32 %v530_v21  ;;  %v542_v25 = vand.u32 2147483648, %v530_v21  ;;  %v540_v27 = vand.u32 2147483647, %v530_v21  ;;  %vm536_vm1 = vweird.f32 %v530_v21 }
 0x790   :  { %754 = vtanh.f32 %v525_v17 }
 0x791   :  { %v543_v29 = vor.u32 1.1754944e-38, %v542_v25  ;;  %vm541_vm3 = vcmp.eq.f32.partialorder %v540_v27, 8.507059e+37 }
 0x795   :  { %v753_v22 = vpop.eup %752 }
 0x796   :  { %v532_v23 = vmul.f32 %v753_v22, %v530_v21  ;;  %vm537_vm0 = vweird.f32 %v753_v22  ;;  %v755_v32 = vpop.eup %754 }
 0x797   :  { %vm538_vm2 = vmor %vm536_vm1, %vm537_vm0 }
 0x798   :  { %v533_v24 = vsub.f32 1.0, %v532_v23  ;;  %v701_v23 = vld [vmem:[%s1205_s5] ss:$0 sm:$0xff] }
 0x79a   :  { %v534_v26 = vmul.f32 %v753_v22, %v533_v24 }
 0x79c   :  { %v535_v28 = vadd.f32 %v753_v22, %v534_v26 }
 0x79e   :  { %v539_v31 = vsel %vm538_vm2, %v753_v22, %v535_v28 }
 0x79f   :  { %v544_v33 = vsel %vm541_vm3, %v543_v29, %v539_v31 }
 0x7a0   :  { %v546_v34 = vsel %vm1078_vm4, %v755_v32, %v544_v33 }
 0x7a1   :  { %551 = vrot.lane.b32.xlu2 %v546_v34, %s853_s3  ;;  %549 = vrot.lane.b32.xlu1 %v546_v34, %s855_s15 }
 0x7a2   :  { %547 = vrot.lane.b32.xlu0 %v546_v34, %s854_s14 }
 0x7fb   :  { %v552_v43 = vpop.permute.xlu2 %551 }
 0x813   :  { %v550_v35 = vpop.permute.xlu1 %549 }
 0x814   :  { %v554_v37 = vmul.f32 %v550_v35, %v546_v34  ;;  %v548_v38 = vpop.permute.xlu0 %547 }
 0x815   :  { %v553_v39 = vmul.f32 %v548_v38, %v501_v9  ;;  %v77_v9 = vld [vmem:[#allocation5 + $0x18] sm:$0xff] }
 0x816   :  { %630 = vmatpush.msra.mxu2 %v77_v9 }
 0x817   :  { %v555_v40 = vadd.f32 %v554_v37, %v553_v39 }
 0x818   :  { %631 = vmatpush.msra.mxu2 %v76_v10 }
 0x819   :  { %v1178_v41 = vsel %vm174_vm8, %v555_v40, 0.0 }
 0x81a   :  { %756 = vtanh.f32 %v1178_v41  ;;  %632 = vmatpush.msra.mxu2 %v75_v11 }
 0x81c   :  { %633 = vmatpush.msra.mxu2 %v74_v12 }
 0x820   :  { %v757_v42 = vpop.eup %756 }
 0x821   :  { %v558_v44 = vmul.f32 %v757_v42, %v552_v43 }
 0x823   :  { %688 = vmatmul.msk.f32.vlgmr.msra.gmra.mxu1 %vm174_vm8, %v558_v44 }
 0x8a0   :  { %v577_v46 = vpop.f32.mrf.mxu1 }
 0x8a1   :  { %v580_v47 = vadd.f32 %v577_v46, %v167_v45 }
 0x8a3   :  { %v689_v48 = vmul.f32 -1.442695, %v580_v47 }
 0x8a5   :  { %758 = vpow2.f32 %v689_v48 }
 0x8ab   :  { %v759_v49 = vpop.eup %758 }
 0x8ac   :  { %v585_v50 = vadd.f32 1.0, %v759_v49 }
 0x8ae   :  { %760 = vrcp.f32 %v585_v50  ;;  %v597_v54 = vand.u32 2147483648, %v585_v50  ;;  %v595_v56 = vand.u32 2147483647, %v585_v50  ;;  %vm591_vm6 = vweird.f32 %v585_v50 }
 0x8af   :  { %762 = vtanh.f32 %v580_v47 }
 0x8b0   :  { %v598_v58 = vor.u32 1.1754944e-38, %v597_v54  ;;  %vm596_vm9 = vcmp.eq.f32.partialorder %v595_v56, 8.507059e+37 }
 0x8b4   :  { %v761_v51 = vpop.eup %760 }
 0x8b5   :  { %v587_v52 = vmul.f32 %v761_v51, %v585_v50  ;;  %vm592_vm5 = vweird.f32 %v761_v51  ;;  %v763_v59 = vpop.eup %762 }
 0x8b6   :  { %vm593_vm7 = vmor %vm591_vm6, %vm592_vm5 }
 0x8b7   :  { %v588_v53 = vsub.f32 1.0, %v587_v52 }
 0x8b9   :  { %v589_v55 = vmul.f32 %v761_v51, %v588_v53 }
 0x8bb   :  { %v590_v57 = vadd.f32 %v761_v51, %v589_v55 }
 0x8bd   :  { %v594_v20 = vsel %vm593_vm7, %v761_v51, %v590_v57 }
 0x8be   :  { %v599_v60 = vsel %vm596_vm9, %v598_v58, %v594_v20 }
 0x8bf   :  { %v601_v61 = vsel %vm1078_vm4, %v763_v59, %v599_v60 }
 0x8c0   :  { %606 = vrot.lane.b32.xlu2 %v601_v61, %s853_s3  ;;  %604 = vrot.lane.b32.xlu1 %v601_v61, %s855_s15 }
 0x8c1   :  { %602 = vrot.lane.b32.xlu0 %v601_v61, %s854_s14 }
 0x91a   :  { %v607_v21 = vpop.permute.xlu2 %606 }
 0x932   :  { %v605_v13 = vpop.permute.xlu1 %604 }
 0x933   :  { %v609_v14 = vmul.f32 %v605_v13, %v601_v61  ;;  %v603_v15 = vpop.permute.xlu0 %602 }
 0x934   :  { %v608_v16 = vmul.f32 %v603_v15, %v1178_v41 }
 0x936   :  { %v610_v17 = vadd.f32 %v609_v14, %v608_v16 }
 0x938   :  { %v611_v18 = vsel %vm174_vm8, %v610_v17, 0.0 }
 0x939   :  { %764 = vtanh.f32 %v611_v18 }
 0x93f   :  { %v765_v19 = vpop.eup %764 }
 0x940   :  { %v613_v22 = vmul.f32 %v765_v19, %v607_v21 }
 0x942   :  { %690 = vmatmul.msk.f32.vlgmr.msra.gmra.mxu2 %vm174_vm8, %v613_v22 }
 0x9c5   :  { %v635_v24 = vpop.f32.mrf.mxu2 }
 0x9c6   :  { %v636_v25 = vadd.f32 %v701_v23, %v635_v24 }
 0x9c8   :  { %638 = vmax.xlane.f32.xlu0 %v636_v25 }
 0xa3b   :  { %v639_v26 = vpop.xlane.xlu0 %638 }
 0xa3c   :  { %v640_v27 = vsub.f32 %v636_v25, %v639_v26 }
 0xa3e   :  { %v641_v28 = vmul.f32 1.442695, %v640_v27 }
 0xa40   :  { %766 = vpow2.f32 %v641_v28 }
 0xa46   :  { %v767_v29 = vpop.eup %766 }
 0xa47   :  { %643 = vadd.xlane.f32.xlu1 %v767_v29 }
 0xaba   :  { %v644_v31 = vpop.xlane.xlu1 %643 }
 0xabb   :  { %768 = vlog2.f32 %v644_v31 }
 0xac1   :  { %v769_v32 = vpop.eup %768 }
 0xac2   :  { %v646_v30 = vmul.f32 0.6931472, %v769_v32 }
 0xac4   :  { %v647_v33 = vsub.f32 %v640_v27, %v646_v30 }
 0xac6   :  { %648 = vst [vmem:[#allocation7] sm:$0xff] %v647_v33 }
 0xac7   :  { %659 = dma.vmem_to_hbm [thread:$0]  %s655_s8, 128, %s657_s9, [#allocation4]  }
 0xac8   :  { %846 = dma.done.wait [#allocation4], 128  }
 0xac9   :  { %847 = vsyncadd [#allocation4], 4294967168 }
 0xaca   :  { %664 = vsyncpa [#allocation3], 1 }
 0xacb   :  { %665 = vsyncpa [#allocation6], 1 }
 0xacc   :  { %666 = vsyncpa [#allocation4], 1 }

</bundles_post_ra>
